<compile_context>
chip_gen: v7x
topology: tpu7x:2x2x1
jax: 0.10.0
libtpu: 0.0.40
codegen_flags: <defaults>
</compile_context>

<pallas_src>
import functools

import jax
import jax.numpy as jnp
from jax.experimental import pallas as pl
from jax.experimental.pallas import tpu as pltpu


# ----------------------------- model hyperparams ----------------------------
INPUT_DIM = 4
OUTPUT_DIM = 3
DEPTH = 3            # number of residual blocks
BLOCK_DEPTH = 3      # linear layers per residual block
BLOCK_WIDTH = 32     # neurons per layer
N_LAYERS = DEPTH * BLOCK_DEPTH

PACK = 4                               # batch rows packed per lane row
LANES = PACK * BLOCK_WIDTH             # 128 = TPU lane width
PACK_IN = PACK * INPUT_DIM             # 16 lanes of dense packed input


def _round_up(n, m):
    return ((n + m - 1) // m) * m


# ------------------------------- Pallas kernel ------------------------------
def resnet_kernel(x_ref, w_in_ref, b_in_ref, w_blk_ref, b_blk_ref,
                  w_out_ref, b_out_ref, o_ref, *, depth, block_depth,
                  tanh_dtype):
    mm_dtype = w_in_ref.dtype

    # Input Linear on the packed layout: (TBP, 16) @ (16, 128).
    # Lane group g of the output holds (x[4r+g] @ w_in + b_in).
    h = jnp.dot(x_ref[...], w_in_ref[...],
                preferred_element_type=jnp.float32) + b_in_ref[...]

    # Residual blocks.  Block-diagonal (128,128) weights keep the 4 packed
    # batch groups independent; weights are sliced per layer (static index)
    # from the VMEM-resident ref to avoid hoisting 288+ KiB into vregs.
    for blk in range(depth):
        identity = h
        for layer in range(block_depth):
            idx = blk * block_depth + layer
            z = jnp.dot(h.astype(mm_dtype), w_blk_ref[idx],
                        preferred_element_type=jnp.float32) + b_blk_ref[idx]
            h = jnp.tanh(z.astype(tanh_dtype)).astype(jnp.float32)
        h = h + identity

    # Output Linear; lane-dense (128-wide) packed store: group g lanes
    # [32g:32g+3] carry batch row 4r+g's outputs, the rest are zeros.
    o_ref[...] = (jnp.dot(h.astype(mm_dtype), w_out_ref[...],
                          preferred_element_type=jnp.float32) + b_out_ref[...])


# --------------------------- parameter preparation --------------------------
def init_params(key):
    """PyTorch-style uniform(-1/sqrt(fan_in), +) init; weights stored (in, out)."""
    ks = jax.random.split(key, 6)

    def unif(k, shape, fan_in):
        bound = 1.0 / jnp.sqrt(jnp.float32(fan_in))
        return jax.random.uniform(k, shape, jnp.float32, -bound, bound)

    return {
        "w_in":  unif(ks[0], (INPUT_DIM, BLOCK_WIDTH), INPUT_DIM),
        "b_in":  unif(ks[1], (1, BLOCK_WIDTH), INPUT_DIM),
        "w_blk": unif(ks[2], (N_LAYERS, BLOCK_WIDTH, BLOCK_WIDTH), BLOCK_WIDTH),
        "b_blk": unif(ks[3], (N_LAYERS, 1, BLOCK_WIDTH), BLOCK_WIDTH),
        "w_out": unif(ks[4], (BLOCK_WIDTH, OUTPUT_DIM), BLOCK_WIDTH),
        "b_out": unif(ks[5], (1, OUTPUT_DIM), BLOCK_WIDTH),
    }


def pack_params(params, matmul_dtype):
    """Build block-structured lane-dense weights for the 4-way packed layout."""
    BW = BLOCK_WIDTH

    # Input weight (16, 128): rows [4g:4g+4] -> lanes [32g:32g+32].
    w_in_p = jnp.zeros((PACK_IN, LANES), jnp.float32)
    # Output weight (128, 128): rows [32g:32g+32] -> lanes [32g:32g+3].
    w_out_p = jnp.zeros((LANES, LANES), jnp.float32)
    b_out_p = jnp.zeros((1, LANES), jnp.float32)
    # Block weights (9, 128, 128): block-diagonal replication of (32, 32).
    w_blk_p = jnp.zeros((N_LAYERS, LANES, LANES), jnp.float32)

    for g in range(PACK):
        w_in_p = w_in_p.at[g * INPUT_DIM:(g + 1) * INPUT_DIM,
                           g * BW:(g + 1) * BW].set(params["w_in"])
        w_blk_p = w_blk_p.at[:, g * BW:(g + 1) * BW,
                             g * BW:(g + 1) * BW].set(params["w_blk"])
        w_out_p = w_out_p.at[g * BW:(g + 1) * BW,
                             g * BW:g * BW + OUTPUT_DIM].set(params["w_out"])
        b_out_p = b_out_p.at[:, g * BW:g * BW + OUTPUT_DIM].set(params["b_out"])

    return {
        "w_in":  w_in_p.astype(matmul_dtype),
        "b_in":  jnp.tile(params["b_in"], (1, PACK)).astype(jnp.float32),
        "w_blk": w_blk_p.astype(matmul_dtype),
        "b_blk": jnp.tile(params["b_blk"], (1, 1, PACK)).astype(jnp.float32),
        "w_out": w_out_p.astype(matmul_dtype),
        "b_out": b_out_p,
    }


# --------------------------------- wrapper ----------------------------------
def resnet_forward(x, params, *, tile_b=2048, matmul_dtype=jnp.bfloat16,
                   tanh_dtype=jnp.float32):
    """x: (B, INPUT_DIM) float32 -> (B, OUTPUT_DIM) float32."""
    B = x.shape[0]

    # Packed rows: PACK(=4) batch rows per row of the packed layout.
    R = -(-B // PACK)
    # Packed-row tile: multiple of 16 sublanes (covers f32 and bf16 tiling).
    tbp_req = max(16, _round_up(max(1, tile_b // PACK), 16))
    # Cap at ~half the work so the "parallel" axis yields >= 2 balanced tiles
    # (keeps both v7x TensorCores busy); no effect on v5e/v6e correctness.
    tbp_cap = max(16, _round_up(-(-R // 2), 16))
    tbp = min(tbp_req, tbp_cap)
    num_tiles = -(-R // tbp)
    Rp = num_tiles * tbp
    Bp = Rp * PACK

    # Dense packed input: (Bp, 4) -> contiguous reshape (Rp, 16); lane group g
    # of packed row r holds batch row 4r+g.  bf16 in the bf16 path halves the
    # remaining (already nearly minimal) input HBM stream.
    xp = (jnp.zeros((Bp, INPUT_DIM), jnp.float32).at[:B].set(x)
          .astype(matmul_dtype).reshape(Rp, PACK_IN))

    p = pack_params(params, matmul_dtype)

    kernel = functools.partial(resnet_kernel, depth=DEPTH,
                               block_depth=BLOCK_DEPTH, tanh_dtype=tanh_dtype)

    # Advisory cost estimate (real packed traffic) for XLA's scheduler.
    flops = 2 * Rp * (PACK_IN * LANES + N_LAYERS * LANES * LANES
                      + LANES * LANES)
    transcendentals = Rp * N_LAYERS * LANES
    param_bytes = sum(int(v.size) * v.dtype.itemsize for v in p.values())
    bytes_accessed = (Rp * PACK_IN * jnp.dtype(matmul_dtype).itemsize
                      + Rp * LANES * 4 + param_bytes)

    out_packed = pl.pallas_call(
        kernel,
        out_shape=jax.ShapeDtypeStruct((Rp, LANES), jnp.float32),
        grid=(num_tiles,),
        in_specs=[
            # packed activations: tiled along the batch-grid axis
            pl.BlockSpec((tbp, PACK_IN), lambda i: (i, 0)),
            # weights/biases: constant index_map -> VMEM-resident across steps
            pl.BlockSpec((PACK_IN, LANES), lambda i: (0, 0)),
            pl.BlockSpec((1, LANES), lambda i: (0, 0)),
            pl.BlockSpec((N_LAYERS, LANES, LANES), lambda i: (0, 0, 0)),
            pl.BlockSpec((N_LAYERS, 1, LANES), lambda i: (0, 0, 0)),
            pl.BlockSpec((LANES, LANES), lambda i: (0, 0)),
            pl.BlockSpec((1, LANES), lambda i: (0, 0)),
        ],
        out_specs=pl.BlockSpec((tbp, LANES), lambda i: (i, 0)),
        compiler_params=pltpu.CompilerParams(
            dimension_semantics=("parallel",)),
        cost_estimate=pl.CostEstimate(flops=flops,
                                      transcendentals=transcendentals,
                                      bytes_accessed=bytes_accessed),
    )(xp, p["w_in"], p["b_in"], p["w_blk"], p["b_blk"], p["w_out"], p["b_out"])

    # Unpack: (Rp, 128) -> (Bp, 32): row 4r+g <- packed[r, 32g:32g+32];
    # the real outputs sit in the first OUTPUT_DIM lanes of each group.
    return out_packed.reshape(Bp, BLOCK_WIDTH)[:B, :OUTPUT_DIM]


# ----------------------------- pure-JAX reference ---------------------------
def resnet_reference(x, p):
    h = x @ p["w_in"] + p["b_in"]
    for blk in range(DEPTH):
        identity = h
        for layer in range(BLOCK_DEPTH):
            idx = blk * BLOCK_DEPTH + layer
            h = jnp.tanh(h @ p["w_blk"][idx] + p["b_blk"][idx])
        h = h + identity
    return h @ p["w_out"] + p["b_out"]


if __name__ == "__main__":
    key = jax.random.PRNGKey(0)
    k_x, k_p = jax.random.split(key)
    params = init_params(k_p)

    # --- small batch, f32 matmuls: tight numerical check vs reference -------
    x_small = jax.random.normal(k_x, (8, INPUT_DIM), jnp.float32)
    out_small = jax.block_until_ready(
        resnet_forward(x_small, params, matmul_dtype=jnp.float32))
    ref_small = resnet_reference(x_small, params)
    assert out_small.shape == (8, OUTPUT_DIM)
    assert jnp.allclose(out_small, ref_small, atol=1e-5, rtol=1e-5), \
        "f32 small-batch mismatch vs reference"

    # --- larger batch exercising multiple grid tiles (f32) ------------------
    x_big = jax.random.normal(k_x, (1000, INPUT_DIM), jnp.float32)
    ref_big = resnet_reference(x_big, params)

    out_big_f32 = jax.block_until_ready(
        resnet_forward(x_big, params, tile_b=256, matmul_dtype=jnp.float32))
    assert out_big_f32.shape == (1000, OUTPUT_DIM)
    assert jnp.allclose(out_big_f32, ref_big, atol=1e-5, rtol=1e-5), \
        "f32 tiled-batch mismatch vs reference"

    # bf16 matmul inputs (f32 accumulation + f32 tanh): MXU fast path, all gens
    out_big_bf16 = jax.block_until_ready(
        resnet_forward(x_big, params, matmul_dtype=jnp.bfloat16))
    assert jnp.allclose(out_big_bf16, ref_big, atol=5e-2, rtol=5e-2), \
        "bf16 tiled-batch mismatch vs reference"

    # bf16 matmuls + bf16 tanh: v6e/v7x EUP fast path (keep f32 tanh on v5e)
    out_big_bf16t = jax.block_until_ready(
        resnet_forward(x_big, params, matmul_dtype=jnp.bfloat16,
                       tanh_dtype=jnp.bfloat16))
    assert jnp.allclose(out_big_bf16t, ref_big, atol=1e-1, rtol=1e-1), \
        "bf16-tanh tiled-batch mismatch vs reference"

    print("KERNEL_OK")
</pallas_src>

<mosaic_0001>
module attributes {stable_mosaic.version = 11 : i64} {
  func.func @resnet_kernel(%arg0: i32, %arg1: memref<16x16xf32, #tpu.memory_space<vmem>>, %arg2: memref<16x128xf32, #tpu.memory_space<vmem>>, %arg3: memref<1x128xf32, #tpu.memory_space<vmem>>, %arg4: memref<9x128x128xf32, #tpu.memory_space<vmem>>, %arg5: memref<9x1x128xf32, #tpu.memory_space<vmem>>, %arg6: memref<128x128xf32, #tpu.memory_space<vmem>>, %arg7: memref<1x128xf32, #tpu.memory_space<vmem>>, %arg8: memref<16x128xf32, #tpu.memory_space<vmem>>) attributes {dimension_semantics = [#tpu.dimension_semantics<parallel>], iteration_bounds = array<i64: 1>, scalar_prefetch = 0 : i64, scratch_operands = 0 : i64, tpu.core_type = #tpu.core_type<tc>, window_params = [{transform_indices = @transform_0, window_bounds = array<i64: 16, 16>}, {pipeline_mode = #tpu.pipeline_mode<synchronous>, transform_indices = @transform_1, window_bounds = array<i64: 16, 128>}, {pipeline_mode = #tpu.pipeline_mode<synchronous>, transform_indices = @transform_2, window_bounds = array<i64: 1, 128>}, {pipeline_mode = #tpu.pipeline_mode<synchronous>, transform_indices = @transform_3, window_bounds = array<i64: 9, 128, 128>}, {pipeline_mode = #tpu.pipeline_mode<synchronous>, transform_indices = @transform_4, window_bounds = array<i64: 9, 1, 128>}, {pipeline_mode = #tpu.pipeline_mode<synchronous>, transform_indices = @transform_5, window_bounds = array<i64: 128, 128>}, {pipeline_mode = #tpu.pipeline_mode<synchronous>, transform_indices = @transform_6, window_bounds = array<i64: 1, 128>}, {transform_indices = @transform_7, window_bounds = array<i64: 16, 128>}]} {
    %c0 = arith.constant 0 : index
    %c0_0 = arith.constant 0 : index
    %0 = vector.load %arg1[%c0, %c0_0] : memref<16x16xf32, #tpu.memory_space<vmem>>, vector<16x16xf32>
    %c0_1 = arith.constant 0 : index
    %c0_2 = arith.constant 0 : index
    %1 = vector.load %arg2[%c0_1, %c0_2] : memref<16x128xf32, #tpu.memory_space<vmem>>, vector<16x128xf32>
    %cst = arith.constant dense<0.000000e+00> : vector<16x128xf32>
    %2 = tpu.matmul %0, %1, %cst {dimension_numbers = #tpu.dot_dimension_numbers<[1], [0], [0], [1], [0, 0, 1, 1], [], []>} : vector<16x16xf32>, vector<16x128xf32>, vector<16x128xf32> -> vector<16x128xf32>
    %c0_3 = arith.constant 0 : index
    %c0_4 = arith.constant 0 : index
    %3 = vector.load %arg3[%c0_3, %c0_4] : memref<1x128xf32, #tpu.memory_space<vmem>>, vector<1x128xf32>
    %4 = vector.broadcast %3 : vector<1x128xf32> to vector<16x128xf32>
    %5 = arith.addf %2, %4 : vector<16x128xf32>
    %c0_5 = arith.constant 0 : index
    %c0_6 = arith.constant 0 : index
    %c0_7 = arith.constant 0 : index
    %6 = vector.load %arg4[%c0_5, %c0_6, %c0_7] : memref<9x128x128xf32, #tpu.memory_space<vmem>>, vector<1x128x128xf32>
    %7 = vector.shape_cast %6 : vector<1x128x128xf32> to vector<128x128xf32>
    %cst_8 = arith.constant dense<0.000000e+00> : vector<16x128xf32>
    %8 = tpu.matmul %5, %7, %cst_8 {dimension_numbers = #tpu.dot_dimension_numbers<[1], [0], [0], [1], [0, 0, 1, 1], [], []>} : vector<16x128xf32>, vector<128x128xf32>, vector<16x128xf32> -> vector<16x128xf32>
    %c0_9 = arith.constant 0 : index
    %c0_10 = arith.constant 0 : index
    %c0_11 = arith.constant 0 : index
    %9 = vector.load %arg5[%c0_9, %c0_10, %c0_11] : memref<9x1x128xf32, #tpu.memory_space<vmem>>, vector<1x1x128xf32>
    %10 = vector.shape_cast %9 : vector<1x1x128xf32> to vector<1x128xf32>
    %11 = vector.broadcast %10 : vector<1x128xf32> to vector<16x128xf32>
    %12 = arith.addf %8, %11 : vector<16x128xf32>
    %13 = math.tanh %12 : vector<16x128xf32>
    %c1 = arith.constant 1 : index
    %c0_12 = arith.constant 0 : index
    %c0_13 = arith.constant 0 : index
    %14 = vector.load %arg4[%c1, %c0_12, %c0_13] : memref<9x128x128xf32, #tpu.memory_space<vmem>>, vector<1x128x128xf32>
    %15 = vector.shape_cast %14 : vector<1x128x128xf32> to vector<128x128xf32>
    %cst_14 = arith.constant dense<0.000000e+00> : vector<16x128xf32>
    %16 = tpu.matmul %13, %15, %cst_14 {dimension_numbers = #tpu.dot_dimension_numbers<[1], [0], [0], [1], [0, 0, 1, 1], [], []>} : vector<16x128xf32>, vector<128x128xf32>, vector<16x128xf32> -> vector<16x128xf32>
    %c1_15 = arith.constant 1 : index
    %c0_16 = arith.constant 0 : index
    %c0_17 = arith.constant 0 : index
    %17 = vector.load %arg5[%c1_15, %c0_16, %c0_17] : memref<9x1x128xf32, #tpu.memory_space<vmem>>, vector<1x1x128xf32>
    %18 = vector.shape_cast %17 : vector<1x1x128xf32> to vector<1x128xf32>
    %19 = vector.broadcast %18 : vector<1x128xf32> to vector<16x128xf32>
    %20 = arith.addf %16, %19 : vector<16x128xf32>
    %21 = math.tanh %20 : vector<16x128xf32>
    %c2 = arith.constant 2 : index
    %c0_18 = arith.constant 0 : index
    %c0_19 = arith.constant 0 : index
    %22 = vector.load %arg4[%c2, %c0_18, %c0_19] : memref<9x128x128xf32, #tpu.memory_space<vmem>>, vector<1x128x128xf32>
    %23 = vector.shape_cast %22 : vector<1x128x128xf32> to vector<128x128xf32>
    %cst_20 = arith.constant dense<0.000000e+00> : vector<16x128xf32>
    %24 = tpu.matmul %21, %23, %cst_20 {dimension_numbers = #tpu.dot_dimension_numbers<[1], [0], [0], [1], [0, 0, 1, 1], [], []>} : vector<16x128xf32>, vector<128x128xf32>, vector<16x128xf32> -> vector<16x128xf32>
    %c2_21 = arith.constant 2 : index
    %c0_22 = arith.constant 0 : index
    %c0_23 = arith.constant 0 : index
    %25 = vector.load %arg5[%c2_21, %c0_22, %c0_23] : memref<9x1x128xf32, #tpu.memory_space<vmem>>, vector<1x1x128xf32>
    %26 = vector.shape_cast %25 : vector<1x1x128xf32> to vector<1x128xf32>
    %27 = vector.broadcast %26 : vector<1x128xf32> to vector<16x128xf32>
    %28 = arith.addf %24, %27 : vector<16x128xf32>
    %29 = math.tanh %28 : vector<16x128xf32>
    %30 = arith.addf %29, %5 : vector<16x128xf32>
    %c3 = arith.constant 3 : index
    %c0_24 = arith.constant 0 : index
    %c0_25 = arith.constant 0 : index
    %31 = vector.load %arg4[%c3, %c0_24, %c0_25] : memref<9x128x128xf32, #tpu.memory_space<vmem>>, vector<1x128x128xf32>
    %32 = vector.shape_cast %31 : vector<1x128x128xf32> to vector<128x128xf32>
    %cst_26 = arith.constant dense<0.000000e+00> : vector<16x128xf32>
    %33 = tpu.matmul %30, %32, %cst_26 {dimension_numbers = #tpu.dot_dimension_numbers<[1], [0], [0], [1], [0, 0, 1, 1], [], []>} : vector<16x128xf32>, vector<128x128xf32>, vector<16x128xf32> -> vector<16x128xf32>
    %c3_27 = arith.constant 3 : index
    %c0_28 = arith.constant 0 : index
    %c0_29 = arith.constant 0 : index
    %34 = vector.load %arg5[%c3_27, %c0_28, %c0_29] : memref<9x1x128xf32, #tpu.memory_space<vmem>>, vector<1x1x128xf32>
    %35 = vector.shape_cast %34 : vector<1x1x128xf32> to vector<1x128xf32>
    %36 = vector.broadcast %35 : vector<1x128xf32> to vector<16x128xf32>
    %37 = arith.addf %33, %36 : vector<16x128xf32>
    %38 = math.tanh %37 : vector<16x128xf32>
    %c4 = arith.constant 4 : index
    %c0_30 = arith.constant 0 : index
    %c0_31 = arith.constant 0 : index
    %39 = vector.load %arg4[%c4, %c0_30, %c0_31] : memref<9x128x128xf32, #tpu.memory_space<vmem>>, vector<1x128x128xf32>
    %40 = vector.shape_cast %39 : vector<1x128x128xf32> to vector<128x128xf32>
    %cst_32 = arith.constant dense<0.000000e+00> : vector<16x128xf32>
    %41 = tpu.matmul %38, %40, %cst_32 {dimension_numbers = #tpu.dot_dimension_numbers<[1], [0], [0], [1], [0, 0, 1, 1], [], []>} : vector<16x128xf32>, vector<128x128xf32>, vector<16x128xf32> -> vector<16x128xf32>
    %c4_33 = arith.constant 4 : index
    %c0_34 = arith.constant 0 : index
    %c0_35 = arith.constant 0 : index
    %42 = vector.load %arg5[%c4_33, %c0_34, %c0_35] : memref<9x1x128xf32, #tpu.memory_space<vmem>>, vector<1x1x128xf32>
    %43 = vector.shape_cast %42 : vector<1x1x128xf32> to vector<1x128xf32>
    %44 = vector.broadcast %43 : vector<1x128xf32> to vector<16x128xf32>
    %45 = arith.addf %41, %44 : vector<16x128xf32>
    %46 = math.tanh %45 : vector<16x128xf32>
    %c5 = arith.constant 5 : index
    %c0_36 = arith.constant 0 : index
    %c0_37 = arith.constant 0 : index
    %47 = vector.load %arg4[%c5, %c0_36, %c0_37] : memref<9x128x128xf32, #tpu.memory_space<vmem>>, vector<1x128x128xf32>
    %48 = vector.shape_cast %47 : vector<1x128x128xf32> to vector<128x128xf32>
    %cst_38 = arith.constant dense<0.000000e+00> : vector<16x128xf32>
    %49 = tpu.matmul %46, %48, %cst_38 {dimension_numbers = #tpu.dot_dimension_numbers<[1], [0], [0], [1], [0, 0, 1, 1], [], []>} : vector<16x128xf32>, vector<128x128xf32>, vector<16x128xf32> -> vector<16x128xf32>
    %c5_39 = arith.constant 5 : index
    %c0_40 = arith.constant 0 : index
    %c0_41 = arith.constant 0 : index
    %50 = vector.load %arg5[%c5_39, %c0_40, %c0_41] : memref<9x1x128xf32, #tpu.memory_space<vmem>>, vector<1x1x128xf32>
    %51 = vector.shape_cast %50 : vector<1x1x128xf32> to vector<1x128xf32>
    %52 = vector.broadcast %51 : vector<1x128xf32> to vector<16x128xf32>
    %53 = arith.addf %49, %52 : vector<16x128xf32>
    %54 = math.tanh %53 : vector<16x128xf32>
    %55 = arith.addf %54, %30 : vector<16x128xf32>
    %c6 = arith.constant 6 : index
    %c0_42 = arith.constant 0 : index
    %c0_43 = arith.constant 0 : index
    %56 = vector.load %arg4[%c6, %c0_42, %c0_43] : memref<9x128x128xf32, #tpu.memory_space<vmem>>, vector<1x128x128xf32>
    %57 = vector.shape_cast %56 : vector<1x128x128xf32> to vector<128x128xf32>
    %cst_44 = arith.constant dense<0.000000e+00> : vector<16x128xf32>
    %58 = tpu.matmul %55, %57, %cst_44 {dimension_numbers = #tpu.dot_dimension_numbers<[1], [0], [0], [1], [0, 0, 1, 1], [], []>} : vector<16x128xf32>, vector<128x128xf32>, vector<16x128xf32> -> vector<16x128xf32>
    %c6_45 = arith.constant 6 : index
    %c0_46 = arith.constant 0 : index
    %c0_47 = arith.constant 0 : index
    %59 = vector.load %arg5[%c6_45, %c0_46, %c0_47] : memref<9x1x128xf32, #tpu.memory_space<vmem>>, vector<1x1x128xf32>
    %60 = vector.shape_cast %59 : vector<1x1x128xf32> to vector<1x128xf32>
    %61 = vector.broadcast %60 : vector<1x128xf32> to vector<16x128xf32>
    %62 = arith.addf %58, %61 : vector<16x128xf32>
    %63 = math.tanh %62 : vector<16x128xf32>
    %c7 = arith.constant 7 : index
    %c0_48 = arith.constant 0 : index
    %c0_49 = arith.constant 0 : index
    %64 = vector.load %arg4[%c7, %c0_48, %c0_49] : memref<9x128x128xf32, #tpu.memory_space<vmem>>, vector<1x128x128xf32>
    %65 = vector.shape_cast %64 : vector<1x128x128xf32> to vector<128x128xf32>
    %cst_50 = arith.constant dense<0.000000e+00> : vector<16x128xf32>
    %66 = tpu.matmul %63, %65, %cst_50 {dimension_numbers = #tpu.dot_dimension_numbers<[1], [0], [0], [1], [0, 0, 1, 1], [], []>} : vector<16x128xf32>, vector<128x128xf32>, vector<16x128xf32> -> vector<16x128xf32>
    %c7_51 = arith.constant 7 : index
    %c0_52 = arith.constant 0 : index
    %c0_53 = arith.constant 0 : index
    %67 = vector.load %arg5[%c7_51, %c0_52, %c0_53] : memref<9x1x128xf32, #tpu.memory_space<vmem>>, vector<1x1x128xf32>
    %68 = vector.shape_cast %67 : vector<1x1x128xf32> to vector<1x128xf32>
    %69 = vector.broadcast %68 : vector<1x128xf32> to vector<16x128xf32>
    %70 = arith.addf %66, %69 : vector<16x128xf32>
    %71 = math.tanh %70 : vector<16x128xf32>
    %c8 = arith.constant 8 : index
    %c0_54 = arith.constant 0 : index
    %c0_55 = arith.constant 0 : index
    %72 = vector.load %arg4[%c8, %c0_54, %c0_55] : memref<9x128x128xf32, #tpu.memory_space<vmem>>, vector<1x128x128xf32>
    %73 = vector.shape_cast %72 : vector<1x128x128xf32> to vector<128x128xf32>
    %cst_56 = arith.constant dense<0.000000e+00> : vector<16x128xf32>
    %74 = tpu.matmul %71, %73, %cst_56 {dimension_numbers = #tpu.dot_dimension_numbers<[1], [0], [0], [1], [0, 0, 1, 1], [], []>} : vector<16x128xf32>, vector<128x128xf32>, vector<16x128xf32> -> vector<16x128xf32>
    %c8_57 = arith.constant 8 : index
    %c0_58 = arith.constant 0 : index
    %c0_59 = arith.constant 0 : index
    %75 = vector.load %arg5[%c8_57, %c0_58, %c0_59] : memref<9x1x128xf32, #tpu.memory_space<vmem>>, vector<1x1x128xf32>
    %76 = vector.shape_cast %75 : vector<1x1x128xf32> to vector<1x128xf32>
    %77 = vector.broadcast %76 : vector<1x128xf32> to vector<16x128xf32>
    %78 = arith.addf %74, %77 : vector<16x128xf32>
    %79 = math.tanh %78 : vector<16x128xf32>
    %80 = arith.addf %79, %55 : vector<16x128xf32>
    %c0_60 = arith.constant 0 : index
    %c0_61 = arith.constant 0 : index
    %81 = vector.load %arg6[%c0_60, %c0_61] : memref<128x128xf32, #tpu.memory_space<vmem>>, vector<128x128xf32>
    %cst_62 = arith.constant dense<0.000000e+00> : vector<16x128xf32>
    %82 = tpu.matmul %80, %81, %cst_62 {dimension_numbers = #tpu.dot_dimension_numbers<[1], [0], [0], [1], [0, 0, 1, 1], [], []>} : vector<16x128xf32>, vector<128x128xf32>, vector<16x128xf32> -> vector<16x128xf32>
    %c0_63 = arith.constant 0 : index
    %c0_64 = arith.constant 0 : index
    %83 = vector.load %arg7[%c0_63, %c0_64] : memref<1x128xf32, #tpu.memory_space<vmem>>, vector<1x128xf32>
    %84 = vector.broadcast %83 : vector<1x128xf32> to vector<16x128xf32>
    %85 = arith.addf %82, %84 : vector<16x128xf32>
    %c0_65 = arith.constant 0 : index
    %c0_66 = arith.constant 0 : index
    %86 = vector.load %arg8[%c0_65, %c0_66] : memref<16x128xf32, #tpu.memory_space<vmem>>, vector<16x128xf32>
    tpu.vector_store %arg8[%c0_65, %c0_66], %85 {strides = array<i32>} : memref<16x128xf32, #tpu.memory_space<vmem>>, vector<16x128xf32>,
    return
  }
  func.func @transform_0(%arg0: i32) -> (i32, i32) {
    %c0_i32 = arith.constant 0 : i32
    %c0_i32_0 = arith.constant 0 : i32
    return %arg0, %c0_i32 : i32, i32
  }
  func.func @transform_1(%arg0: i32) -> (i32, i32) {
    %c0_i32 = arith.constant 0 : i32
    %c0_i32_0 = arith.constant 0 : i32
    %c0_i32_1 = arith.constant 0 : i32
    return %c0_i32, %c0_i32_0 : i32, i32
  }
  func.func @transform_2(%arg0: i32) -> (i32, i32) {
    %c0_i32 = arith.constant 0 : i32
    %c0_i32_0 = arith.constant 0 : i32
    %c0_i32_1 = arith.constant 0 : i32
    return %c0_i32, %c0_i32_0 : i32, i32
  }
  func.func @transform_3(%arg0: i32) -> (i32, i32, i32) {
    %c0_i32 = arith.constant 0 : i32
    %c0_i32_0 = arith.constant 0 : i32
    %c0_i32_1 = arith.constant 0 : i32
    %c0_i32_2 = arith.constant 0 : i32
    return %c0_i32, %c0_i32_0, %c0_i32_1 : i32, i32, i32
  }
  func.func @transform_4(%arg0: i32) -> (i32, i32, i32) {
    %c0_i32 = arith.constant 0 : i32
    %c0_i32_0 = arith.constant 0 : i32
    %c0_i32_1 = arith.constant 0 : i32
    %c0_i32_2 = arith.constant 0 : i32
    return %c0_i32, %c0_i32_0, %c0_i32_1 : i32, i32, i32
  }
  func.func @transform_5(%arg0: i32) -> (i32, i32) {
    %c0_i32 = arith.constant 0 : i32
    %c0_i32_0 = arith.constant 0 : i32
    %c0_i32_1 = arith.constant 0 : i32
    return %c0_i32, %c0_i32_0 : i32, i32
  }
  func.func @transform_6(%arg0: i32) -> (i32, i32) {
    %c0_i32 = arith.constant 0 : i32
    %c0_i32_0 = arith.constant 0 : i32
    %c0_i32_1 = arith.constant 0 : i32
    return %c0_i32, %c0_i32_0 : i32, i32
  }
  func.func @transform_7(%arg0: i32) -> (i32, i32) {
    %c0_i32 = arith.constant 0 : i32
    %c0_i32_0 = arith.constant 0 : i32
    return %arg0, %c0_i32 : i32, i32
  }
}

</mosaic_0001>

<bundles_post_ra>
// kernel: tpu_custom_call.1
= control target key start
LH: loop header
LB: loop body
LE: loop exit
PB: predicated region body
PF: predicated region fallthrough
CT: control target
= control target key end

     0   :  { %12 = vsyncpa [#allocation3], 0  ;;  %s2458_s0 = inlined_call_operand.hbm [shape: f32[16,16], index: 0, kind: input, shape index: {}]   ;;  %s2459_s1 = inlined_call_operand.hbm [shape: f32[16,128], index: 1, kind: input, shape index: {}]   ;;  %s2460_s2 = inlined_call_operand.vmem [shape: f32[1,128], index: 2, kind: input, shape index: {}]   ;;  %s2461_s3 = inlined_call_operand.hbm [shape: f32[9,128,128], index: 3, kind: input, shape index: {}]   ;;  %s2462_s4 = inlined_call_operand.vmem [shape: f32[9,1,128], index: 4, kind: input, shape index: {}]   ;;  %s2463_s5 = inlined_call_operand.hbm [shape: f32[128,128], index: 5, kind: input, shape index: {}]   ;;  %s2464_s6 = inlined_call_operand.vmem [shape: f32[1,128], index: 6, kind: input, shape index: {}]   ;;  %s2465_s7 = inlined_call_operand.hbm [shape: f32[16,128], index: 7, kind: output, shape index: {}]  }
   0x1   :  { %13 = vsyncpa [#allocation6], 0 }
   0x2   :  { %14 = vsyncpa [#allocation9], 0 }
   0x3   :  { %15 = vsyncpa [#allocation4], 0  ;;  %s2263_s24 = smov [#allocation5]   ;;  %s2264_s26 = smov [#allocation2]  }
   0x4   :  { %s33_s25 = sshll.u32 %s2263_s24, 4  ;;  %s21_s27 = sshll.u32 %s2264_s26, 4  ;;  %s34_s25 = int_to_ptr.vmem [resolvable:$true] %s33_s25  ;;  %s2310_s27 = int_to_ptr.vmem [resolvable:$true] %s21_s27 }
   0x5   :  { %s2145_s30 = scalar_lea.hbm %s2459_s1, 256 }
   0x6   :  { %p2146_p0 = scmp.ne.s32.totalorder %s2459_s1, %s2145_s30  ;;  %p2149_p1 = scmp.lt.u32.totalorder %s2145_s30, %s2459_s1 }
   0x8   :  { %p2151_p2 = pnand %p2149_p1, %p2146_p0 }
   0xa   :  { %2154 = shalt.err (!%p2151_p2)
}
   0xb   :  { %s2155_s12 = scalar_lea.vmem %s34_s25, 256  ;;  %p2160_p4 = scmp.lt.s32.totalorder %s34_s25, %s34_s25 }
   0xc   :  { %p2156_p3 = scmp.ne.s32.totalorder %s34_s25, %s2155_s12  ;;  %p2161_p5 = scmp.lt.s32.totalorder %s2155_s12, %s2155_s12 }
   0xe   :  { %p2162_p6 = por %p2161_p5, %p2160_p4 }
  0x10   :  { %p2163_p7 = pnand %p2162_p6, %p2156_p3 }
  0x12   :  { %2166 = shalt.err (!%p2163_p7)
}
  0x13   :  { %s2265_s13 = smov 128   ;;  %s2266_s14 = smov 8  }
  0x14   :  { %39 = dma.hbm_to_vmem [thread:$0]  %s2459_s1, 256, %s34_s25, [#allocation6], %s2265_s13, %s2265_s13, %s2266_s14  }
  0x15   :  { %s2167_s19 = scalar_lea.hbm %s2458_s0, 256 }
  0x16   :  { %p2168_p8 = scmp.ne.s32.totalorder %s2458_s0, %s2167_s19  ;;  %p2171_p9 = scmp.lt.u32.totalorder %s2167_s19, %s2458_s0 }
  0x18   :  { %p2173_p10 = pnand %p2171_p9, %p2168_p8 }
  0x1a   :  { %2176 = shalt.err (!%p2173_p10)
}
  0x1b   :  { %s2177_s24 = scalar_lea.vmem %s2310_s27, 256  ;;  %p2182_p12 = scmp.lt.s32.totalorder %s2310_s27, %s2310_s27 }
  0x1c   :  { %p2178_p11 = scmp.ne.s32.totalorder %s2310_s27, %s2177_s24  ;;  %p2183_p13 = scmp.lt.s32.totalorder %s2177_s24, %s2177_s24 }
  0x1e   :  { %p2184_p0 = por %p2183_p13, %p2182_p12 }
  0x20   :  { %p2185_p1 = pnand %p2184_p0, %p2178_p11 }
  0x22   :  { %2188 = shalt.err (!%p2185_p1)
}
  0x23   :  { %27 = dma.hbm_to_vmem [thread:$0]  %s2458_s0, 256, %s2310_s27, [#allocation3], %s2265_s13, %s2265_s13, %s2266_s14  }
  0x24   :  { %s2267_s26 = smov [#allocation7]   ;;  %s2268_s29 = smov [#allocation8]  }
  0x25   :  { %s47_s28 = sshll.u32 %s2267_s26, 4  ;;  %s61_s30 = sshll.u32 %s2268_s29, 4  ;;  %s48_s28 = int_to_ptr.vmem [resolvable:$true] %s47_s28  ;;  %s2347_s30 = int_to_ptr.vmem [resolvable:$true] %s61_s30 }
  0x26   :  { %s2189_s10 = scalar_lea.hbm %s2461_s3, 18432 }
  0x27   :  { %p2190_p2 = scmp.ne.s32.totalorder %s2461_s3, %s2189_s10  ;;  %p2193_p3 = scmp.lt.u32.totalorder %s2189_s10, %s2461_s3 }
  0x29   :  { %p2195_p4 = pnand %p2193_p3, %p2190_p2 }
  0x2b   :  { %2198 = shalt.err (!%p2195_p4)
}
  0x2c   :  { %s2199_s0 = scalar_lea.vmem %s48_s28, 18432  ;;  %p2204_p6 = scmp.lt.s32.totalorder %s48_s28, %s48_s28 }
  0x2d   :  { %p2200_p5 = scmp.ne.s32.totalorder %s48_s28, %s2199_s0  ;;  %p2205_p7 = scmp.lt.s32.totalorder %s2199_s0, %s2199_s0 }
  0x2f   :  { %p2206_p8 = por %p2205_p7, %p2204_p6 }
  0x31   :  { %p2207_p9 = pnand %p2206_p8, %p2200_p5 }
  0x33   :  { %2210 = shalt.err (!%p2207_p9)
}
  0x34   :  { %53 = dma.hbm_to_vmem [thread:$0]  %s2461_s3, 18432, %s48_s28, [#allocation6], %s2265_s13, %s2265_s13, %s2266_s14  }
  0x35   :  { %s2211_s20 = scalar_lea.hbm %s2463_s5, 2048 }
  0x36   :  { %p2212_p10 = scmp.ne.s32.totalorder %s2463_s5, %s2211_s20  ;;  %p2215_p11 = scmp.lt.u32.totalorder %s2211_s20, %s2463_s5 }
  0x38   :  { %p2217_p12 = pnand %p2215_p11, %p2212_p10 }
  0x3a   :  { %2220 = shalt.err (!%p2217_p12)
}
  0x3b   :  { %s2221_s1 = scalar_lea.vmem %s2347_s30, 2048  ;;  %p2226_p0 = scmp.lt.s32.totalorder %s2347_s30, %s2347_s30 }
  0x3c   :  { %p2222_p13 = scmp.ne.s32.totalorder %s2347_s30, %s2221_s1  ;;  %p2227_p1 = scmp.lt.s32.totalorder %s2221_s1, %s2221_s1 }
  0x3e   :  { %p2228_p2 = por %p2227_p1, %p2226_p0 }
  0x40   :  { %p2229_p3 = pnand %p2228_p2, %p2222_p13 }
  0x42   :  { %2232 = shalt.err (!%p2229_p3)
}
  0x43   :  { %67 = dma.hbm_to_vmem [thread:$0]  %s2463_s5, 2048, %s2347_s30, [#allocation9], %s2265_s13, %s2265_s13, %s2266_s14  }
  0x44   :  { %2255 = dma.done.wait [#allocation3], 256  }
  0x45   :  { %2256 = vsyncadd [#allocation3], 4294967040 }
  0x46   :  { %2257 = dma.done.wait [#allocation6], 18688  }
  0x47   :  { %2258 = vsyncadd [#allocation6], 4294948608 }
  0x48   :  { %2259 = dma.done.wait [#allocation9], 2048  }
  0x49   :  { %2260 = vsyncadd [#allocation9], 4294965248  ;;  %vm93_vm0 = vcmask 130048   ;;  %v84_v0 = vld [vmem:[#allocation5] sm:$0xff]  ;;  %v85_v1 = vld [vmem:[#allocation5 + $0x8] sm:$0xff]  ;;  %s2269_s24 = smov [#allocation10]  }
  0x4a   :  { %v82_v2 = vld [vmem:[#allocation2] sm:$0xff]  ;;  %v1778_v3 = vpack.c.bf16 %v85_v1, %v84_v0  ;;  %v176_v5 = vld [vmem:[#allocation7 + $0x8] sm:$0xff]  ;;  %v177_v7 = vld [vmem:[#allocation7 + $0x10] sm:$0xff] }
  0x4b   :  { %1425 = vmatprep.mubr.msk.f32.mxu0 %vm93_vm0, %v82_v2  ;;  %v175_v4 = vld [vmem:[#allocation7] sm:$0xff]  ;;  %v178_v8 = vld [vmem:[#allocation7 + $0x18] sm:$0xff]  ;;  %v180_v11 = vld [vmem:[#allocation7 + $0x28] sm:$0xff] }
  0x4c   :  { %v1782_v6 = vpack.c.bf16 %v176_v5, %v175_v4  ;;  %1779 = vmatprep.subr.bf16.mxu0 %v1778_v3  ;;  %v1786_v9 = vpack.c.bf16 %v178_v8, %v177_v7  ;;  %v179_v10 = vld [vmem:[#allocation7 + $0x20] sm:$0xff]  ;;  %v83_v12 = vld [vmem:[#allocation2 + $0x8] sm:$0xff]  ;;  %v181_v14 = vld [vmem:[#allocation7 + $0x30] sm:$0xff] }
  0x4d   :  { %1781 = vmatpush3.bf16.msra.mxu0 %v1778_v3  ;;  %v1790_v13 = vpack.c.bf16 %v180_v11, %v179_v10  ;;  %v182_v15 = vld [vmem:[#allocation7 + $0x38] sm:$0xff]  ;;  %v183_v17 = vld [vmem:[#allocation7 + $0x40] sm:$0xff]  ;;  %v184_v18 = vld [vmem:[#allocation7 + $0x48] sm:$0xff] }
  0x4e   :  { %1783 = vmatprep.subr.bf16.mxu1 %v1782_v6  ;;  %v1794_v16 = vpack.c.bf16 %v182_v15, %v181_v14  ;;  %v1798_v19 = vpack.c.bf16 %v184_v18, %v183_v17  ;;  %v185_v20 = vld [vmem:[#allocation7 + $0x50] sm:$0xff]  ;;  %v186_v21 = vld [vmem:[#allocation7 + $0x58] sm:$0xff]  ;;  %v187_v23 = vld [vmem:[#allocation7 + $0x60] sm:$0xff] }
  0x4f   :  { %1785 = vmatpush3.bf16.msra.mxu1 %v1782_v6  ;;  %v1802_v22 = vpack.c.bf16 %v186_v21, %v185_v20  ;;  %v188_v24 = vld [vmem:[#allocation7 + $0x68] sm:$0xff]  ;;  %v189_v26 = vld [vmem:[#allocation7 + $0x70] sm:$0xff]  ;;  %v190_v27 = vld [vmem:[#allocation7 + $0x78] sm:$0xff] }
  0x50   :  { %1787 = vmatprep.subr.bf16.mxu1 %v1786_v9  ;;  %1426 = vmatmul.mubr.msk.f32.vlgmr.msra.gmra.mrb[0].mxu0 %vm93_vm0, %v83_v12  ;;  %v1806_v25 = vpack.c.bf16 %v188_v24, %v187_v23  ;;  %v1810_v28 = vpack.c.bf16 %v190_v27, %v189_v26  ;;  %v276_v29 = vld [vmem:[#allocation7 + $0x80] sm:$0xff]  ;;  %v277_v30 = vld [vmem:[#allocation7 + $0x88] sm:$0xff]  ;;  %v278_v31 = vld [vmem:[#allocation7 + $0x90] sm:$0xff] }
  0x51   :  { %v1814_v32 = vpack.c.bf16 %v277_v30, %v276_v29  ;;  %v279_v33 = vld [vmem:[#allocation7 + $0x98] sm:$0xff]  ;;  %v280_v35 = vld [vmem:[#allocation7 + $0xa0] sm:$0xff]  ;;  %v281_v36 = vld [vmem:[#allocation7 + $0xa8] sm:$0xff] }
  0x52   :  { %v1818_v34 = vpack.c.bf16 %v279_v33, %v278_v31  ;;  %v1822_v37 = vpack.c.bf16 %v281_v36, %v280_v35  ;;  %v282_v38 = vld [vmem:[#allocation7 + $0xb0] sm:$0xff]  ;;  %v283_v39 = vld [vmem:[#allocation7 + $0xb8] sm:$0xff]  ;;  %v1216_v41 = vld [vmem:[%s2460_s2] ss:$0 sm:$0xff] }
  0x53   :  { %1789 = vmatpush3.bf16.msra.mxu1 %v1786_v9  ;;  %1815 = vmatprep.subr.bf16.mxu0 %v1814_v32  ;;  %v1826_v40 = vpack.c.bf16 %v283_v39, %v282_v38  ;;  %v284_v46 = vld [vmem:[#allocation7 + $0xc0] sm:$0xff]  ;;  %v285_v47 = vld [vmem:[#allocation7 + $0xc8] sm:$0xff]  ;;  %v286_v49 = vld [vmem:[#allocation7 + $0xd0] sm:$0xff] }
  0x54   :  { %1791 = vmatprep.subr.bf16.mxu1 %v1790_v13  ;;  %1817 = vmatpush3.bf16.msra.mxu0 %v1814_v32  ;;  %v1830_v48 = vpack.c.bf16 %v285_v47, %v284_v46  ;;  %v287_v50 = vld [vmem:[#allocation7 + $0xd8] sm:$0xff]  ;;  %v288_v52 = vld [vmem:[#allocation7 + $0xe0] sm:$0xff]  ;;  %v289_v53 = vld [vmem:[#allocation7 + $0xe8] sm:$0xff] }
  0x55   :  { %1819 = vmatprep.subr.bf16.mxu0 %v1818_v34  ;;  %v1834_v51 = vpack.c.bf16 %v287_v50, %v286_v49  ;;  %v290_v54 = vld [vmem:[#allocation7 + $0xf0] sm:$0xff]  ;;  %v1838_v55 = vpack.c.bf16 %v289_v53, %v288_v52  ;;  %v291_v56 = vld [vmem:[#allocation7 + $0xf8] sm:$0xff]  ;;  %v378_v58 = vld [vmem:[#allocation7 + $0x100] sm:$0xff] }
  0x56   :  { %v1842_v57 = vpack.c.bf16 %v291_v56, %v290_v54  ;;  %v379_v59 = vld [vmem:[#allocation7 + $0x108] sm:$0xff]  ;;  %v380_v60 = vld [vmem:[#allocation7 + $0x110] sm:$0xff]  ;;  %v381_v62 = vld [vmem:[#allocation7 + $0x118] sm:$0xff] }
  0x57   :  { %1793 = vmatpush3.bf16.msra.mxu1 %v1790_v13  ;;  %v1846_v61 = vpack.c.bf16 %v379_v59, %v378_v58  ;;  %v1850_v63 = vpack.c.bf16 %v381_v62, %v380_v60  ;;  %v382_v0 = vld [vmem:[#allocation7 + $0x120] sm:$0xff]  ;;  %v383_v1 = vld [vmem:[#allocation7 + $0x128] sm:$0xff]  ;;  %v384_v3 = vld [vmem:[#allocation7 + $0x130] sm:$0xff] }
  0x58   :  { %1795 = vmatprep.subr.bf16.mxu1 %v1794_v16  ;;  %1821 = vmatpush3.bf16.msra.mxu0 %v1818_v34  ;;  %v1854_v2 = vpack.c.bf16 %v383_v1, %v382_v0  ;;  %v385_v4 = vld [vmem:[#allocation7 + $0x138] sm:$0xff]  ;;  %v1219_v6 = vld [vmem:[%s2462_s4] ss:$0 sm:$0xff]  ;;  %v387_v14 = vld [vmem:[#allocation7 + $0x148] sm:$0xff] }
  0x59   :  { %1823 = vmatprep.subr.bf16.mxu0 %v1822_v37  ;;  %v1858_v5 = vpack.c.bf16 %v385_v4, %v384_v3  ;;  %v386_v13 = vld [vmem:[#allocation7 + $0x140] sm:$0xff]  ;;  %v389_v17 = vld [vmem:[#allocation7 + $0x158] sm:$0xff]  ;;  %v391_v20 = vld [vmem:[#allocation7 + $0x168] sm:$0xff] }
  0x5a   :  { %v1862_v15 = vpack.c.bf16 %v387_v14, %v386_v13  ;;  %v392_v21 = vld [vmem:[#allocation7 + $0x170] sm:$0xff]  ;;  %v393_v23 = vld [vmem:[#allocation7 + $0x178] sm:$0xff]  ;;  %v483_v26 = vld [vmem:[#allocation7 + $0x188] sm:$0xff] }
  0x5b   :  { %1797 = vmatpush3.bf16.msra.mxu1 %v1794_v16  ;;  %v388_v16 = vld [vmem:[#allocation7 + $0x150] sm:$0xff]  ;;  %v1874_v24 = vpack.c.bf16 %v393_v23, %v392_v21  ;;  %v485_v29 = vld [vmem:[#allocation7 + $0x198] sm:$0xff]  ;;  %v486_v31 = vld [vmem:[#allocation7 + $0x1a0] sm:$0xff] }
  0x5c   :  { %1799 = vmatprep.subr.bf16.mxu1 %v1798_v19  ;;  %1825 = vmatpush3.bf16.msra.mxu0 %v1822_v37  ;;  %v1866_v18 = vpack.c.bf16 %v389_v17, %v388_v16  ;;  %v484_v27 = vld [vmem:[#allocation7 + $0x190] sm:$0xff]  ;;  %v487_v32 = vld [vmem:[#allocation7 + $0x1a8] sm:$0xff]  ;;  %v489_v35 = vld [vmem:[#allocation7 + $0x1b8] sm:$0xff] }
  0x5d   :  { %1827 = vmatprep.subr.bf16.mxu0 %v1826_v40  ;;  %v1882_v30 = vpack.c.bf16 %v485_v29, %v484_v27  ;;  %v1886_v33 = vpack.c.bf16 %v487_v32, %v486_v31  ;;  %v488_v34 = vld [vmem:[#allocation7 + $0x1b0] sm:$0xff]  ;;  %v1221_v37 = vld [vmem:[%s2462_s4 + $0x1] ss:$0 sm:$0xff]  ;;  %v491_v47 = vld [vmem:[#allocation7 + $0x1c8] sm:$0xff] }
  0x5e   :  { %v1890_v36 = vpack.c.bf16 %v489_v35, %v488_v34  ;;  %v490_v46 = vld [vmem:[#allocation7 + $0x1c0] sm:$0xff]  ;;  %v492_v49 = vld [vmem:[#allocation7 + $0x1d0] sm:$0xff]  ;;  %v493_v50 = vld [vmem:[#allocation7 + $0x1d8] sm:$0xff] }
  0x5f   :  { %1801 = vmatpush3.bf16.msra.mxu1 %v1798_v19  ;;  %v390_v19 = vld [vmem:[#allocation7 + $0x160] sm:$0xff]  ;;  %v495_v53 = vld [vmem:[#allocation7 + $0x1e8] sm:$0xff]  ;;  %v497_v56 = vld [vmem:[#allocation7 + $0x1f8] sm:$0xff] }
  0x60   :  { %1803 = vmatprep.subr.bf16.mxu1 %v1802_v22  ;;  %1829 = vmatpush3.bf16.msra.mxu0 %v1826_v40  ;;  %v494_v52 = vld [vmem:[#allocation7 + $0x1e0] sm:$0xff]  ;;  %v585_v59 = vld [vmem:[#allocation7 + $0x208] sm:$0xff]  ;;  %v586_v60 = vld [vmem:[#allocation7 + $0x210] sm:$0xff] }
  0x61   :  { %1831 = vmatprep.subr.bf16.mxu0 %v1830_v48  ;;  %v1902_v54 = vpack.c.bf16 %v495_v53, %v494_v52  ;;  %v584_v58 = vld [vmem:[#allocation7 + $0x200] sm:$0xff]  ;;  %v587_v62 = vld [vmem:[#allocation7 + $0x218] sm:$0xff]  ;;  %v589_v1 = vld [vmem:[#allocation7 + $0x228] sm:$0xff] }
  0x62   :  { %v588_v0 = vld [vmem:[#allocation7 + $0x220] sm:$0xff]  ;;  %v590_v3 = vld [vmem:[#allocation7 + $0x230] sm:$0xff]  ;;  %v591_v4 = vld [vmem:[#allocation7 + $0x238] sm:$0xff] }
  0x63   :  { %1805 = vmatpush3.bf16.msra.mxu1 %v1802_v22  ;;  %v1870_v22 = vpack.c.bf16 %v391_v20, %v390_v19  ;;  %v593_v16 = vld [vmem:[#allocation7 + $0x248] sm:$0xff]  ;;  %v595_v19 = vld [vmem:[#allocation7 + $0x258] sm:$0xff]  ;;  %v596_v21 = vld [vmem:[#allocation7 + $0x260] sm:$0xff] }
  0x64   :  { %1807 = vmatprep.subr.bf16.mxu1 %v1806_v25  ;;  %1833 = vmatpush3.bf16.msra.mxu0 %v1830_v48  ;;  %v1894_v48 = vpack.c.bf16 %v491_v47, %v490_v46  ;;  %v688_v27 = vld [vmem:[#allocation7 + $0x290] sm:$0xff]  ;;  %v689_v29 = vld [vmem:[#allocation7 + $0x298] sm:$0xff]  ;;  %v690_v31 = vld [vmem:[#allocation7 + $0x2a0] sm:$0xff] }
  0x65   :  { %1835 = vmatprep.subr.bf16.mxu0 %v1834_v51  ;;  %v691_v32 = vld [vmem:[#allocation7 + $0x2a8] sm:$0xff]  ;;  %v692_v34 = vld [vmem:[#allocation7 + $0x2b0] sm:$0xff]  ;;  %v693_v35 = vld [vmem:[#allocation7 + $0x2b8] sm:$0xff] }
  0x66   :  { %v694_v46 = vld [vmem:[#allocation7 + $0x2c0] sm:$0xff]  ;;  %v695_v47 = vld [vmem:[#allocation7 + $0x2c8] sm:$0xff] }
  0x67   :  { %1809 = vmatpush3.bf16.msra.mxu1 %v1806_v25  ;;  %v482_v25 = vld [vmem:[#allocation7 + $0x180] sm:$0xff]  ;;  %v699_v53 = vld [vmem:[#allocation7 + $0x2e8] sm:$0xff] }
  0x68   :  { %1811 = vmatprep.subr.bf16.mxu1 %v1810_v28  ;;  %1837 = vmatpush3.bf16.msra.mxu0 %v1834_v51  ;;  %v1898_v51 = vpack.c.bf16 %v493_v50, %v492_v49  ;;  %v696_v49 = vld [vmem:[#allocation7 + $0x2d0] sm:$0xff]  ;;  %v697_v50 = vld [vmem:[#allocation7 + $0x2d8] sm:$0xff]  ;;  %v698_v52 = vld [vmem:[#allocation7 + $0x2e0] sm:$0xff] }
  0x69   :  { %1839 = vmatprep.subr.bf16.mxu0 %v1838_v55 }
  0x6b   :  { %1813 = vmatpush3.bf16.msra.mxu1 %v1810_v28  ;;  %v1878_v28 = vpack.c.bf16 %v483_v26, %v482_v25  ;;  %v686_v25 = vld [vmem:[#allocation7 + $0x280] sm:$0xff]  ;;  %v687_v26 = vld [vmem:[#allocation7 + $0x288] sm:$0xff] }
  0x6c   :  { %1841 = vmatpush3.bf16.msra.mxu0 %v1838_v55  ;;  %1847 = vmatprep.subr.bf16.mxu1 %v1846_v61  ;;  %v496_v55 = vld [vmem:[#allocation7 + $0x1f0] sm:$0xff] }
  0x6d   :  { %1843 = vmatprep.subr.bf16.mxu0 %v1842_v57 }
  0x70   :  { %1845 = vmatpush3.bf16.msra.mxu0 %v1842_v57  ;;  %v1906_v57 = vpack.c.bf16 %v497_v56, %v496_v55  ;;  %v1966_v55 = vpack.c.bf16 %v699_v53, %v698_v52  ;;  %v701_v56 = vld [vmem:[#allocation7 + $0x2f8] sm:$0xff] }
  0x71   :  { %1879 = vmatprep.subr.bf16.mxu0 %v1878_v28  ;;  %v903_v52 = vld [vmem:[#allocation7 + $0x3d8] sm:$0xff] }
 0x123   :  { %v1427_v42 = vpop.f32.mrb[0].mxu0 }
 0x124   :  { %v166_v43 = vpop.f32.mrb[1].mxu0  ;;  %v2391_v45 = vadd.f32 %v1427_v42, %v1216_v41 }
 0x125   :  { %v2389_v44 = vadd.f32 %v1216_v41, %v166_v43 }
 0x127   :  { %1460 = vmatprep.mubr.f32.mxu1 %v2389_v44 }
 0x128   :  { %1461 = vmatmul.mubr.f32.vlgmr.msra.gmra.mrb[0].mxu1 %v2391_v45 }
 0x129   :  { %1849 = vmatpush3.bf16.msra.mxu1 %v1846_v61  ;;  %v1910_v61 = vpack.c.bf16 %v585_v59, %v584_v58  ;;  %v790_v58 = vld [vmem:[#allocation7 + $0x300] sm:$0xff]  ;;  %v791_v59 = vld [vmem:[#allocation7 + $0x308] sm:$0xff] }
 0x12a   :  { %1851 = vmatprep.subr.bf16.mxu1 %v1850_v63 }
 0x12d   :  { %1853 = vmatpush3.bf16.msra.mxu1 %v1850_v63  ;;  %v1914_v63 = vpack.c.bf16 %v587_v62, %v586_v60  ;;  %v792_v60 = vld [vmem:[#allocation7 + $0x310] sm:$0xff]  ;;  %v793_v62 = vld [vmem:[#allocation7 + $0x318] sm:$0xff] }
 0x12e   :  { %1855 = vmatprep.subr.bf16.mxu1 %v1854_v2 }
 0x131   :  { %1857 = vmatpush3.bf16.msra.mxu1 %v1854_v2  ;;  %v1918_v2 = vpack.c.bf16 %v589_v1, %v588_v0  ;;  %v794_v0 = vld [vmem:[#allocation7 + $0x320] sm:$0xff]  ;;  %v795_v1 = vld [vmem:[#allocation7 + $0x328] sm:$0xff] }
 0x132   :  { %1859 = vmatprep.subr.bf16.mxu1 %v1858_v5 }
 0x135   :  { %1861 = vmatpush3.bf16.msra.mxu1 %v1858_v5  ;;  %v1922_v5 = vpack.c.bf16 %v591_v4, %v590_v3  ;;  %v796_v3 = vld [vmem:[#allocation7 + $0x330] sm:$0xff]  ;;  %v797_v4 = vld [vmem:[#allocation7 + $0x338] sm:$0xff] }
 0x136   :  { %1863 = vmatprep.subr.bf16.mxu1 %v1862_v15 }
 0x139   :  { %1865 = vmatpush3.bf16.msra.mxu1 %v1862_v15  ;;  %v592_v15 = vld [vmem:[#allocation7 + $0x240] sm:$0xff] }
 0x13a   :  { %1867 = vmatprep.subr.bf16.mxu1 %v1866_v18  ;;  %v1926_v17 = vpack.c.bf16 %v593_v16, %v592_v15  ;;  %v798_v15 = vld [vmem:[#allocation7 + $0x340] sm:$0xff]  ;;  %v799_v16 = vld [vmem:[#allocation7 + $0x348] sm:$0xff] }
 0x13d   :  { %1869 = vmatpush3.bf16.msra.mxu1 %v1866_v18  ;;  %v594_v18 = vld [vmem:[#allocation7 + $0x250] sm:$0xff] }
 0x13e   :  { %1871 = vmatprep.subr.bf16.mxu1 %v1870_v22  ;;  %v1930_v20 = vpack.c.bf16 %v595_v19, %v594_v18  ;;  %v800_v18 = vld [vmem:[#allocation7 + $0x350] sm:$0xff]  ;;  %v801_v19 = vld [vmem:[#allocation7 + $0x358] sm:$0xff] }
 0x141   :  { %1873 = vmatpush3.bf16.msra.mxu1 %v1870_v22  ;;  %v597_v22 = vld [vmem:[#allocation7 + $0x268] sm:$0xff] }
 0x142   :  { %1875 = vmatprep.subr.bf16.mxu1 %v1874_v24  ;;  %v1934_v23 = vpack.c.bf16 %v597_v22, %v596_v21  ;;  %v802_v21 = vld [vmem:[#allocation7 + $0x360] sm:$0xff]  ;;  %v803_v22 = vld [vmem:[#allocation7 + $0x368] sm:$0xff] }
 0x145   :  { %1877 = vmatpush3.bf16.msra.mxu1 %v1874_v24 }
 0x146   :  { %1911 = vmatprep.subr.bf16.mxu1 %v1910_v61 }
 0x1fb   :  { %v1462_v7 = vpop.f32.mrb[0].mxu1 }
 0x1fc   :  { %v270_v8 = vadd.f32 %v1462_v7, %v1219_v6  ;;  %v264_v9 = vpop.f32.mrb[1].mxu1 }
 0x1fd   :  { %v265_v10 = vadd.f32 %v1219_v6, %v264_v9  ;;  %v1223_v6 = vld [vmem:[%s2462_s4 + $0x2] ss:$0 sm:$0xff] }
 0x1ff   :  { %2109 = vtanh.f32 %v265_v10 }
 0x200   :  { %2111 = vtanh.f32 %v270_v8 }
 0x209   :  { %v2110_v11 = vpop.eup %2109 }
 0x20a   :  { %v2112_v12 = vpop.eup %2111  ;;  %1495 = vmatprep.mubr.f32.mxu0 %v2110_v11 }
 0x20b   :  { %1496 = vmatmul.mubr.f32.vlgmr.msra.gmra.mrb[2].mxu0 %v2112_v12 }
 0x20c   :  { %1881 = vmatpush3.bf16.msra.mxu0 %v1878_v28  ;;  %v1942_v28 = vpack.c.bf16 %v687_v26, %v686_v25  ;;  %v892_v25 = vld [vmem:[#allocation7 + $0x380] sm:$0xff]  ;;  %v893_v26 = vld [vmem:[#allocation7 + $0x388] sm:$0xff] }
 0x20d   :  { %1883 = vmatprep.subr.bf16.mxu0 %v1882_v30 }
 0x210   :  { %1885 = vmatpush3.bf16.msra.mxu0 %v1882_v30  ;;  %v1946_v30 = vpack.c.bf16 %v689_v29, %v688_v27  ;;  %v894_v27 = vld [vmem:[#allocation7 + $0x390] sm:$0xff]  ;;  %v895_v29 = vld [vmem:[#allocation7 + $0x398] sm:$0xff] }
 0x211   :  { %1887 = vmatprep.subr.bf16.mxu0 %v1886_v33 }
 0x214   :  { %1889 = vmatpush3.bf16.msra.mxu0 %v1886_v33  ;;  %v1950_v33 = vpack.c.bf16 %v691_v32, %v690_v31  ;;  %v896_v31 = vld [vmem:[#allocation7 + $0x3a0] sm:$0xff]  ;;  %v897_v32 = vld [vmem:[#allocation7 + $0x3a8] sm:$0xff] }
 0x215   :  { %1891 = vmatprep.subr.bf16.mxu0 %v1890_v36 }
 0x218   :  { %1893 = vmatpush3.bf16.msra.mxu0 %v1890_v36  ;;  %v1954_v36 = vpack.c.bf16 %v693_v35, %v692_v34  ;;  %v898_v34 = vld [vmem:[#allocation7 + $0x3b0] sm:$0xff]  ;;  %v899_v35 = vld [vmem:[#allocation7 + $0x3b8] sm:$0xff] }
 0x219   :  { %1895 = vmatprep.subr.bf16.mxu0 %v1894_v48 }
 0x21c   :  { %1897 = vmatpush3.bf16.msra.mxu0 %v1894_v48  ;;  %v1958_v48 = vpack.c.bf16 %v695_v47, %v694_v46 }
 0x21d   :  { %1899 = vmatprep.subr.bf16.mxu0 %v1898_v51 }
 0x220   :  { %1901 = vmatpush3.bf16.msra.mxu0 %v1898_v51  ;;  %v1962_v51 = vpack.c.bf16 %v697_v50, %v696_v49  ;;  %v901_v49 = vld [vmem:[#allocation7 + $0x3c8] sm:$0xff] }
 0x221   :  { %1903 = vmatprep.subr.bf16.mxu0 %v1902_v54 }
 0x224   :  { %1905 = vmatpush3.bf16.msra.mxu0 %v1902_v54  ;;  %v700_v54 = vld [vmem:[#allocation7 + $0x2f0] sm:$0xff] }
 0x225   :  { %1907 = vmatprep.subr.bf16.mxu0 %v1906_v57 }
 0x228   :  { %1909 = vmatpush3.bf16.msra.mxu0 %v1906_v57  ;;  %v1970_v57 = vpack.c.bf16 %v701_v56, %v700_v54  ;;  %v904_v54 = vld [vmem:[#allocation7 + $0x3e0] sm:$0xff] }
 0x229   :  { %1943 = vmatprep.subr.bf16.mxu0 %v1942_v28 }
 0x2de   :  { %v1497_v38 = vpop.f32.mrb[2].mxu0 }
 0x2df   :  { %v372_v39 = vadd.f32 %v1497_v38, %v1221_v37  ;;  %v366_v40 = vpop.f32.mrb[3].mxu0 }
 0x2e0   :  { %v367_v41 = vadd.f32 %v1221_v37, %v366_v40  ;;  %v1225_v37 = vld [vmem:[%s2462_s4 + $0x3] ss:$0 sm:$0xff] }
 0x2e2   :  { %2113 = vtanh.f32 %v367_v41 }
 0x2e3   :  { %2115 = vtanh.f32 %v372_v39 }
 0x2ec   :  { %v2114_v42 = vpop.eup %2113 }
 0x2ed   :  { %v2116_v43 = vpop.eup %2115  ;;  %1530 = vmatprep.mubr.f32.mxu1 %v2114_v42 }
 0x2ee   :  { %1531 = vmatmul.mubr.f32.vlgmr.msra.gmra.mrb[2].mxu1 %v2116_v43 }
 0x2ef   :  { %1913 = vmatpush3.bf16.msra.mxu1 %v1910_v61  ;;  %v1974_v61 = vpack.c.bf16 %v791_v59, %v790_v58  ;;  %v994_v58 = vld [vmem:[#allocation7 + $0x400] sm:$0xff]  ;;  %v995_v59 = vld [vmem:[#allocation7 + $0x408] sm:$0xff] }
 0x2f0   :  { %1915 = vmatprep.subr.bf16.mxu1 %v1914_v63 }
 0x2f3   :  { %1917 = vmatpush3.bf16.msra.mxu1 %v1914_v63  ;;  %v1978_v63 = vpack.c.bf16 %v793_v62, %v792_v60  ;;  %v996_v60 = vld [vmem:[#allocation7 + $0x410] sm:$0xff]  ;;  %v997_v62 = vld [vmem:[#allocation7 + $0x418] sm:$0xff] }
 0x2f4   :  { %1919 = vmatprep.subr.bf16.mxu1 %v1918_v2 }
 0x2f7   :  { %1921 = vmatpush3.bf16.msra.mxu1 %v1918_v2  ;;  %v1982_v2 = vpack.c.bf16 %v795_v1, %v794_v0  ;;  %v998_v0 = vld [vmem:[#allocation7 + $0x420] sm:$0xff]  ;;  %v999_v1 = vld [vmem:[#allocation7 + $0x428] sm:$0xff] }
 0x2f8   :  { %1923 = vmatprep.subr.bf16.mxu1 %v1922_v5 }
 0x2fb   :  { %1925 = vmatpush3.bf16.msra.mxu1 %v1922_v5  ;;  %v1986_v5 = vpack.c.bf16 %v797_v4, %v796_v3  ;;  %v1000_v3 = vld [vmem:[#allocation7 + $0x430] sm:$0xff]  ;;  %v1001_v4 = vld [vmem:[#allocation7 + $0x438] sm:$0xff] }
 0x2fc   :  { %1927 = vmatprep.subr.bf16.mxu1 %v1926_v17 }
 0x2ff   :  { %1929 = vmatpush3.bf16.msra.mxu1 %v1926_v17  ;;  %v1990_v17 = vpack.c.bf16 %v799_v16, %v798_v15  ;;  %v1002_v15 = vld [vmem:[#allocation7 + $0x440] sm:$0xff]  ;;  %v1003_v16 = vld [vmem:[#allocation7 + $0x448] sm:$0xff] }
 0x300   :  { %1931 = vmatprep.subr.bf16.mxu1 %v1930_v20 }
 0x303   :  { %1933 = vmatpush3.bf16.msra.mxu1 %v1930_v20  ;;  %v1994_v20 = vpack.c.bf16 %v801_v19, %v800_v18  ;;  %v1004_v18 = vld [vmem:[#allocation7 + $0x450] sm:$0xff]  ;;  %v1005_v19 = vld [vmem:[#allocation7 + $0x458] sm:$0xff] }
 0x304   :  { %1935 = vmatprep.subr.bf16.mxu1 %v1934_v23 }
 0x307   :  { %1937 = vmatpush3.bf16.msra.mxu1 %v1934_v23  ;;  %v804_v23 = vld [vmem:[#allocation7 + $0x370] sm:$0xff] }
 0x3c1   :  { %v1532_v7 = vpop.f32.mrb[2].mxu1 }
 0x3c2   :  { %v474_v8 = vadd.f32 %v1532_v7, %v1223_v6  ;;  %v468_v9 = vpop.f32.mrb[3].mxu1 }
 0x3c3   :  { %v469_v10 = vadd.f32 %v1223_v6, %v468_v9  ;;  %v1227_v6 = vld [vmem:[%s2462_s4 + $0x4] ss:$0 sm:$0xff] }
 0x3c4   :  { %2117 = vtanh.f32 %v474_v8 }
 0x3c5   :  { %2119 = vtanh.f32 %v469_v10 }
 0x3ce   :  { %v2118_v11 = vpop.eup %2117 }
 0x3cf   :  { %v2120_v12 = vpop.eup %2119  ;;  %v2408_v14 = vadd.f32 %v2118_v11, %v2391_v45  ;;  %v599_v45 = vld [vmem:[#allocation7 + $0x278] sm:$0xff] }
 0x3d0   :  { %v2405_v13 = vadd.f32 %v2120_v12, %v2389_v44  ;;  %v598_v44 = vld [vmem:[#allocation7 + $0x270] sm:$0xff] }
 0x3d1   :  { %v1938_v24 = vpack.c.bf16 %v599_v45, %v598_v44  ;;  %v1998_v44 = vpack.c.bf16 %v803_v22, %v802_v21  ;;  %v805_v45 = vld [vmem:[#allocation7 + $0x378] sm:$0xff]  ;;  %v1006_v21 = vld [vmem:[#allocation7 + $0x460] sm:$0xff]  ;;  %v1007_v22 = vld [vmem:[#allocation7 + $0x468] sm:$0xff] }
 0x3d2   :  { %1565 = vmatprep.mubr.f32.mxu0 %v2405_v13 }
 0x3d3   :  { %1566 = vmatmul.mubr.f32.vlgmr.msra.gmra.mrb[4].mxu0 %v2408_v14  ;;  %1939 = vmatprep.subr.bf16.mxu1 %v1938_v24 }
 0x3d4   :  { %1941 = vmatpush3.bf16.msra.mxu1 %v1938_v24  ;;  %1945 = vmatpush3.bf16.msra.mxu0 %v1942_v28  ;;  %v2002_v24 = vpack.c.bf16 %v805_v45, %v804_v23  ;;  %v2006_v28 = vpack.c.bf16 %v893_v26, %v892_v25  ;;  %v2062_v23 = vpack.c.bf16 %v1007_v22, %v1006_v21  ;;  %v1009_v45 = vld [vmem:[#allocation7 + $0x478] sm:$0xff]  ;;  %v1097_v25 = vld [vmem:[#allocation8] sm:$0xff]  ;;  %v1098_v26 = vld [vmem:[#allocation8 + $0x8] sm:$0xff] }
 0x3d5   :  { %1947 = vmatprep.subr.bf16.mxu0 %v1946_v30  ;;  %1975 = vmatprep.subr.bf16.mxu1 %v1974_v61 }
 0x3d8   :  { %1949 = vmatpush3.bf16.msra.mxu0 %v1946_v30  ;;  %v2010_v30 = vpack.c.bf16 %v895_v29, %v894_v27  ;;  %v1099_v27 = vld [vmem:[#allocation8 + $0x10] sm:$0xff]  ;;  %v1100_v29 = vld [vmem:[#allocation8 + $0x18] sm:$0xff] }
 0x3d9   :  { %1951 = vmatprep.subr.bf16.mxu0 %v1950_v33 }
 0x3dc   :  { %1953 = vmatpush3.bf16.msra.mxu0 %v1950_v33  ;;  %v2014_v33 = vpack.c.bf16 %v897_v32, %v896_v31  ;;  %v1101_v31 = vld [vmem:[#allocation8 + $0x20] sm:$0xff]  ;;  %v1102_v32 = vld [vmem:[#allocation8 + $0x28] sm:$0xff] }
 0x3dd   :  { %1955 = vmatprep.subr.bf16.mxu0 %v1954_v36 }
 0x3e0   :  { %1957 = vmatpush3.bf16.msra.mxu0 %v1954_v36  ;;  %v2018_v36 = vpack.c.bf16 %v899_v35, %v898_v34  ;;  %v1103_v34 = vld [vmem:[#allocation8 + $0x30] sm:$0xff]  ;;  %v1104_v35 = vld [vmem:[#allocation8 + $0x38] sm:$0xff] }
 0x3e1   :  { %1959 = vmatprep.subr.bf16.mxu0 %v1958_v48 }
 0x3e4   :  { %1961 = vmatpush3.bf16.msra.mxu0 %v1958_v48  ;;  %v900_v48 = vld [vmem:[#allocation7 + $0x3c0] sm:$0xff] }
 0x3e5   :  { %1963 = vmatprep.subr.bf16.mxu0 %v1962_v51  ;;  %v2022_v50 = vpack.c.bf16 %v901_v49, %v900_v48  ;;  %v1105_v48 = vld [vmem:[#allocation8 + $0x40] sm:$0xff]  ;;  %v1106_v49 = vld [vmem:[#allocation8 + $0x48] sm:$0xff] }
 0x3e8   :  { %1965 = vmatpush3.bf16.msra.mxu0 %v1962_v51  ;;  %v902_v51 = vld [vmem:[#allocation7 + $0x3d0] sm:$0xff] }
 0x3e9   :  { %1967 = vmatprep.subr.bf16.mxu0 %v1966_v55  ;;  %v2026_v53 = vpack.c.bf16 %v903_v52, %v902_v51  ;;  %v1107_v51 = vld [vmem:[#allocation8 + $0x50] sm:$0xff]  ;;  %v1108_v52 = vld [vmem:[#allocation8 + $0x58] sm:$0xff] }
 0x3ec   :  { %1969 = vmatpush3.bf16.msra.mxu0 %v1966_v55  ;;  %v905_v55 = vld [vmem:[#allocation7 + $0x3e8] sm:$0xff] }
 0x3ed   :  { %1971 = vmatprep.subr.bf16.mxu0 %v1970_v57  ;;  %v2030_v56 = vpack.c.bf16 %v905_v55, %v904_v54  ;;  %v1109_v54 = vld [vmem:[#allocation8 + $0x60] sm:$0xff]  ;;  %v1110_v55 = vld [vmem:[#allocation8 + $0x68] sm:$0xff] }
 0x3f0   :  { %1973 = vmatpush3.bf16.msra.mxu0 %v1970_v57 }
 0x3f1   :  { %2007 = vmatprep.subr.bf16.mxu0 %v2006_v28 }
 0x4a6   :  { %v1567_v38 = vpop.f32.mrb[4].mxu0 }
 0x4a7   :  { %v578_v39 = vadd.f32 %v1567_v38, %v1225_v37  ;;  %v572_v40 = vpop.f32.mrb[5].mxu0 }
 0x4a8   :  { %v573_v41 = vadd.f32 %v1225_v37, %v572_v40  ;;  %v1229_v37 = vld [vmem:[%s2462_s4 + $0x5] ss:$0 sm:$0xff] }
 0x4aa   :  { %2121 = vtanh.f32 %v573_v41 }
 0x4ab   :  { %2123 = vtanh.f32 %v578_v39 }
 0x4b4   :  { %v2122_v42 = vpop.eup %2121 }
 0x4b5   :  { %v2124_v43 = vpop.eup %2123  ;;  %1600 = vmatprep.mubr.f32.mxu1 %v2122_v42 }
 0x4b6   :  { %1601 = vmatmul.mubr.f32.vlgmr.msra.gmra.mrb[4].mxu1 %v2124_v43 }
 0x4b7   :  { %1977 = vmatpush3.bf16.msra.mxu1 %v1974_v61  ;;  %v2038_v61 = vpack.c.bf16 %v995_v59, %v994_v58  ;;  %v1235_v58 = vld [vmem:[%s2462_s4 + $0x8] ss:$0 sm:$0xff] }
 0x4b8   :  { %1979 = vmatprep.subr.bf16.mxu1 %v1978_v63 }
 0x4bb   :  { %1981 = vmatpush3.bf16.msra.mxu1 %v1978_v63  ;;  %v2042_v63 = vpack.c.bf16 %v997_v62, %v996_v60 }
 0x4bc   :  { %1983 = vmatprep.subr.bf16.mxu1 %v1982_v2 }
 0x4bf   :  { %1985 = vmatpush3.bf16.msra.mxu1 %v1982_v2  ;;  %v2046_v2 = vpack.c.bf16 %v999_v1, %v998_v0 }
 0x4c0   :  { %1987 = vmatprep.subr.bf16.mxu1 %v1986_v5 }
 0x4c3   :  { %1989 = vmatpush3.bf16.msra.mxu1 %v1986_v5  ;;  %v2050_v5 = vpack.c.bf16 %v1001_v4, %v1000_v3  ;;  %v1236_v3 = vld [vmem:[%s2464_s6] ss:$0 sm:$0xff] }
 0x4c4   :  { %1991 = vmatprep.subr.bf16.mxu1 %v1990_v17 }
 0x4c7   :  { %1993 = vmatpush3.bf16.msra.mxu1 %v1990_v17  ;;  %v2054_v17 = vpack.c.bf16 %v1003_v16, %v1002_v15 }
 0x4c8   :  { %1995 = vmatprep.subr.bf16.mxu1 %v1994_v20 }
 0x4cb   :  { %1997 = vmatpush3.bf16.msra.mxu1 %v1994_v20  ;;  %v2058_v20 = vpack.c.bf16 %v1005_v19, %v1004_v18 }
 0x4cc   :  { %1999 = vmatprep.subr.bf16.mxu1 %v1998_v44 }
 0x4cf   :  { %2001 = vmatpush3.bf16.msra.mxu1 %v1998_v44  ;;  %v1008_v44 = vld [vmem:[#allocation7 + $0x470] sm:$0xff] }
 0x4d0   :  { %2003 = vmatprep.subr.bf16.mxu1 %v2002_v24 }
 0x4d3   :  { %2005 = vmatpush3.bf16.msra.mxu1 %v2002_v24  ;;  %v2066_v24 = vpack.c.bf16 %v1009_v45, %v1008_v44 }
 0x4d4   :  { %2039 = vmatprep.subr.bf16.mxu1 %v2038_v61 }
 0x589   :  { %v1602_v7 = vpop.f32.mrb[4].mxu1 }
 0x58a   :  { %v680_v8 = vadd.f32 %v1602_v7, %v1227_v6  ;;  %v674_v9 = vpop.f32.mrb[5].mxu1 }
 0x58b   :  { %v675_v10 = vadd.f32 %v1227_v6, %v674_v9  ;;  %v1231_v6 = vld [vmem:[%s2462_s4 + $0x6] ss:$0 sm:$0xff] }
 0x58d   :  { %2125 = vtanh.f32 %v675_v10 }
 0x58e   :  { %2127 = vtanh.f32 %v680_v8 }
 0x597   :  { %v2126_v11 = vpop.eup %2125 }
 0x598   :  { %v2128_v12 = vpop.eup %2127  ;;  %1635 = vmatprep.mubr.f32.mxu0 %v2126_v11 }
 0x599   :  { %1636 = vmatmul.mubr.f32.vlgmr.msra.gmra.mrb[6].mxu0 %v2128_v12 }
 0x59a   :  { %2009 = vmatpush3.bf16.msra.mxu0 %v2006_v28  ;;  %v2070_v28 = vpack.c.bf16 %v1098_v26, %v1097_v25 }
 0x59b   :  { %2011 = vmatprep.subr.bf16.mxu0 %v2010_v30 }
 0x59e   :  { %2013 = vmatpush3.bf16.msra.mxu0 %v2010_v30  ;;  %v2074_v30 = vpack.c.bf16 %v1100_v29, %v1099_v27 }
 0x59f   :  { %2015 = vmatprep.subr.bf16.mxu0 %v2014_v33 }
 0x5a2   :  { %2017 = vmatpush3.bf16.msra.mxu0 %v2014_v33  ;;  %v2078_v33 = vpack.c.bf16 %v1102_v32, %v1101_v31 }
 0x5a3   :  { %2019 = vmatprep.subr.bf16.mxu0 %v2018_v36 }
 0x5a6   :  { %2021 = vmatpush3.bf16.msra.mxu0 %v2018_v36  ;;  %v2082_v36 = vpack.c.bf16 %v1104_v35, %v1103_v34 }
 0x5a7   :  { %2023 = vmatprep.subr.bf16.mxu0 %v2022_v50 }
 0x5aa   :  { %2025 = vmatpush3.bf16.msra.mxu0 %v2022_v50  ;;  %v2086_v50 = vpack.c.bf16 %v1106_v49, %v1105_v48 }
 0x5ab   :  { %2027 = vmatprep.subr.bf16.mxu0 %v2026_v53 }
 0x5ae   :  { %2029 = vmatpush3.bf16.msra.mxu0 %v2026_v53  ;;  %v2090_v53 = vpack.c.bf16 %v1108_v52, %v1107_v51 }
 0x5af   :  { %2031 = vmatprep.subr.bf16.mxu0 %v2030_v56 }
 0x5b2   :  { %2033 = vmatpush3.bf16.msra.mxu0 %v2030_v56  ;;  %v1111_v56 = vld [vmem:[#allocation8 + $0x70] sm:$0xff] }
 0x66c   :  { %v1637_v38 = vpop.f32.mrb[6].mxu0 }
 0x66d   :  { %v782_v39 = vadd.f32 %v1637_v38, %v1229_v37  ;;  %v776_v40 = vpop.f32.mrb[7].mxu0 }
 0x66e   :  { %v777_v41 = vadd.f32 %v1229_v37, %v776_v40  ;;  %v1233_v37 = vld [vmem:[%s2462_s4 + $0x7] ss:$0 sm:$0xff]  ;;  %s1202_s4 = sshll.u32 %s2269_s24, 4  ;;  %s1203_s4 = int_to_ptr.vmem [resolvable:$true] %s1202_s4 }
 0x66f   :  { %2129 = vtanh.f32 %v782_v39  ;;  %s2233_s1 = scalar_lea.vmem %s1203_s4, 256  ;;  %p2238_p5 = scmp.lt.s32.totalorder %s1203_s4, %s1203_s4 }
 0x670   :  { %2131 = vtanh.f32 %v777_v41  ;;  %p2234_p4 = scmp.ne.s32.totalorder %s1203_s4, %s2233_s1  ;;  %p2239_p6 = scmp.lt.s32.totalorder %s2233_s1, %s2233_s1 }
 0x672   :  { %p2240_p7 = por %p2239_p6, %p2238_p5 }
 0x674   :  { %p2241_p8 = pnand %p2240_p7, %p2234_p4 }
 0x679   :  { %v2130_v42 = vpop.eup %2129 }
 0x67a   :  { %v2132_v43 = vpop.eup %2131  ;;  %v2425_v47 = vadd.f32 %v2130_v42, %v2408_v14  ;;  %v907_v14 = vld [vmem:[#allocation7 + $0x3f8] sm:$0xff] }
 0x67b   :  { %v2422_v46 = vadd.f32 %v2132_v43, %v2405_v13  ;;  %v906_v13 = vld [vmem:[#allocation7 + $0x3f0] sm:$0xff] }
 0x67c   :  { %v2034_v57 = vpack.c.bf16 %v907_v14, %v906_v13  ;;  %v2094_v13 = vpack.c.bf16 %v1110_v55, %v1109_v54  ;;  %v1112_v14 = vld [vmem:[#allocation8 + $0x78] sm:$0xff] }
 0x67d   :  { %1670 = vmatprep.mubr.f32.mxu1 %v2422_v46 }
 0x67e   :  { %1671 = vmatmul.mubr.f32.vlgmr.msra.gmra.mrb[6].mxu1 %v2425_v47  ;;  %2035 = vmatprep.subr.bf16.mxu0 %v2034_v57 }
 0x67f   :  { %2037 = vmatpush3.bf16.msra.mxu0 %v2034_v57  ;;  %2041 = vmatpush3.bf16.msra.mxu1 %v2038_v61  ;;  %v2098_v57 = vpack.c.bf16 %v1112_v14, %v1111_v56 }
 0x680   :  { %2043 = vmatprep.subr.bf16.mxu1 %v2042_v63  ;;  %2071 = vmatprep.subr.bf16.mxu0 %v2070_v28 }
 0x683   :  { %2045 = vmatpush3.bf16.msra.mxu1 %v2042_v63 }
 0x684   :  { %2047 = vmatprep.subr.bf16.mxu1 %v2046_v2 }
 0x687   :  { %2049 = vmatpush3.bf16.msra.mxu1 %v2046_v2 }
 0x688   :  { %2051 = vmatprep.subr.bf16.mxu1 %v2050_v5 }
 0x68b   :  { %2053 = vmatpush3.bf16.msra.mxu1 %v2050_v5 }
 0x68c   :  { %2055 = vmatprep.subr.bf16.mxu1 %v2054_v17 }
 0x68f   :  { %2057 = vmatpush3.bf16.msra.mxu1 %v2054_v17 }
 0x690   :  { %2059 = vmatprep.subr.bf16.mxu1 %v2058_v20 }
 0x693   :  { %2061 = vmatpush3.bf16.msra.mxu1 %v2058_v20 }
 0x694   :  { %2063 = vmatprep.subr.bf16.mxu1 %v2062_v23 }
 0x697   :  { %2065 = vmatpush3.bf16.msra.mxu1 %v2062_v23 }
 0x698   :  { %2067 = vmatprep.subr.bf16.mxu1 %v2066_v24 }
 0x69b   :  { %2069 = vmatpush3.bf16.msra.mxu1 %v2066_v24 }
 0x751   :  { %v1672_v7 = vpop.f32.mrb[6].mxu1 }
 0x752   :  { %v886_v8 = vadd.f32 %v1672_v7, %v1231_v6  ;;  %v880_v9 = vpop.f32.mrb[7].mxu1 }
 0x753   :  { %v881_v10 = vadd.f32 %v1231_v6, %v880_v9 }
 0x755   :  { %2133 = vtanh.f32 %v881_v10 }
 0x756   :  { %2135 = vtanh.f32 %v886_v8 }
 0x75f   :  { %v2134_v11 = vpop.eup %2133 }
 0x760   :  { %v2136_v12 = vpop.eup %2135  ;;  %1705 = vmatprep.mubr.f32.mxu0 %v2134_v11 }
 0x761   :  { %1706 = vmatmul.mubr.f32.vlgmr.msra.gmra.mrb[8].mxu0 %v2136_v12 }
 0x762   :  { %2073 = vmatpush3.bf16.msra.mxu0 %v2070_v28 }
 0x763   :  { %2075 = vmatprep.subr.bf16.mxu0 %v2074_v30 }
 0x766   :  { %2077 = vmatpush3.bf16.msra.mxu0 %v2074_v30 }
 0x767   :  { %2079 = vmatprep.subr.bf16.mxu0 %v2078_v33 }
 0x76a   :  { %2081 = vmatpush3.bf16.msra.mxu0 %v2078_v33 }
 0x76b   :  { %2083 = vmatprep.subr.bf16.mxu0 %v2082_v36 }
 0x76e   :  { %2085 = vmatpush3.bf16.msra.mxu0 %v2082_v36 }
 0x76f   :  { %2087 = vmatprep.subr.bf16.mxu0 %v2086_v50 }
 0x772   :  { %2089 = vmatpush3.bf16.msra.mxu0 %v2086_v50 }
 0x773   :  { %2091 = vmatprep.subr.bf16.mxu0 %v2090_v53 }
 0x776   :  { %2093 = vmatpush3.bf16.msra.mxu0 %v2090_v53 }
 0x777   :  { %2095 = vmatprep.subr.bf16.mxu0 %v2094_v13 }
 0x77a   :  { %2097 = vmatpush3.bf16.msra.mxu0 %v2094_v13 }
 0x77b   :  { %2099 = vmatprep.subr.bf16.mxu0 %v2098_v57 }
 0x77e   :  { %2101 = vmatpush3.bf16.msra.mxu0 %v2098_v57 }
 0x834   :  { %v1707_v38 = vpop.f32.mrb[8].mxu0 }
 0x835   :  { %v988_v39 = vadd.f32 %v1707_v38, %v1233_v37  ;;  %v982_v40 = vpop.f32.mrb[9].mxu0 }
 0x836   :  { %v983_v41 = vadd.f32 %v1233_v37, %v982_v40 }
 0x838   :  { %2137 = vtanh.f32 %v983_v41 }
 0x839   :  { %2139 = vtanh.f32 %v988_v39 }
 0x842   :  { %v2138_v42 = vpop.eup %2137 }
 0x843   :  { %v2140_v43 = vpop.eup %2139  ;;  %1740 = vmatprep.mubr.f32.mxu1 %v2138_v42 }
 0x844   :  { %1741 = vmatmul.mubr.f32.vlgmr.msra.gmra.mrb[8].mxu1 %v2140_v43 }
 0x917   :  { %v1742_v59 = vpop.f32.mrb[8].mxu1 }
 0x918   :  { %v1090_v60 = vadd.f32 %v1742_v59, %v1235_v58  ;;  %v1084_v61 = vpop.f32.mrb[9].mxu1 }
 0x919   :  { %v1085_v62 = vadd.f32 %v1235_v58, %v1084_v61 }
 0x91a   :  { %2141 = vtanh.f32 %v1090_v60 }
 0x91b   :  { %2143 = vtanh.f32 %v1085_v62 }
 0x924   :  { %v2142_v63 = vpop.eup %2141 }
 0x925   :  { %v2144_v0 = vpop.eup %2143  ;;  %v1096_v2 = vadd.f32 %v2142_v63, %v2425_v47 }
 0x926   :  { %v1095_v1 = vadd.f32 %v2144_v0, %v2422_v46 }
 0x928   :  { %1775 = vmatprep.mubr.f32.mxu0 %v1095_v1 }
 0x929   :  { %1776 = vmatmul.mubr.f32.vlgmr.msra.gmra.mrb[10].mxu0 %v1096_v2 }
 0x9fc   :  { %v1777_v4 = vpop.f32.mrb[10].mxu0 }
 0x9fd   :  { %v1192_v5 = vadd.f32 %v1777_v4, %v1236_v3  ;;  %v1186_v6 = vpop.f32.mrb[11].mxu0 }
 0x9fe   :  { %v1187_v7 = vadd.f32 %v1236_v3, %v1186_v6 }
 0x9ff   :  { %1196 = vst [vmem:[#allocation10 + $0x8] sm:$0xff] %v1192_v5 }
 0xa00   :  { %1195 = vst [vmem:[#allocation10] sm:$0xff] %v1187_v7 }
 0xa01   :  { %2244 = shalt.err (!%p2241_p8)
}
 0xa02   :  { %s2245_s6 = scalar_lea.hbm %s2465_s7, 256 }
 0xa03   :  { %p2246_p9 = scmp.ne.s32.totalorder %s2465_s7, %s2245_s6  ;;  %p2249_p10 = scmp.lt.u32.totalorder %s2245_s6, %s2465_s7 }
 0xa05   :  { %p2251_p11 = pnand %p2249_p10, %p2246_p9 }
 0xa07   :  { %2254 = shalt.err (!%p2251_p11)
}
 0xa08   :  { %1208 = dma.vmem_to_hbm [thread:$0]  %s1203_s4, 256, %s2465_s7, [#allocation4], %s2265_s13, %s2265_s13, %s2266_s14  }
 0xa09   :  { %2261 = dma.done.wait [#allocation4], 256  }
 0xa0a   :  { %2262 = vsyncadd [#allocation4], 4294967040 }
 0xa0b   :  { %1212 = vsyncpa [#allocation3], 1 }
 0xa0c   :  { %1213 = vsyncpa [#allocation6], 1 }
 0xa0d   :  { %1214 = vsyncpa [#allocation9], 1 }
 0xa0e   :  { %1215 = vsyncpa [#allocation4], 1 }

</bundles_post_ra>
